<compile_context>
chip_gen: v7x
topology: tpu7x:2x2x1
jax: 0.10.0
libtpu: 0.0.40
codegen_flags: <defaults>
</compile_context>

<pallas_src>
import jax
import jax.numpy as jnp
from jax.experimental import pallas as pl
from jax.experimental.pallas import tpu as pltpu

_LANES = 128


def _unified_kernel(scal_ref, x_ref, o_ref):
    # Prefetched scalars in SMEM: [kappa, log(lam), 1/lam].
    kap = scal_ref[0]
    log_lam = scal_ref[1]
    inv_lam = scal_ref[2]

    # TODO(synk): for bf16 inputs on v6e/v7x a bf16 EUP path (skip the f32
    # upcast) would raise the transcendental ceiling; kept f32 for accuracy.
    x = x_ref[...].astype(jnp.float32)
    y = kap * x - log_lam
    neg_y = -y

    # Softplus with beta = -1: (1/beta)*log1p(exp(beta*y)) = -log1p(exp(-y))
    # PyTorch threshold: when beta*y > 20 (i.e. -y > 20) return y directly.
    # Clamp the exp argument on the masked branch so it never produces inf.
    sp = jnp.where(neg_y > 20.0, y,
                   -jnp.log1p(jnp.exp(jnp.minimum(neg_y, 20.0))))

    p = jnp.exp(sp * inv_lam)
    o_ref[...] = (p * x).astype(o_ref.dtype)


def _choose_tile_rows(rows, itemsize):
    """Sublane-aligned tile height targeting ~2 MiB blocks.

    ~2 MiB blocks sit at the measured elementwise HBM roofline; with input and
    output both double-buffered that is ~8 MiB of VMEM, comfortably inside the
    scoped default on v5e (16 MiB), v6e (32 MiB) and v7x (32 MiB per TC).
    """
    sub = max(8, 32 // itemsize)          # 8 for f32, 16 for bf16, 32 for int8
    target_bytes = 2 << 20
    max_rows = max(sub, (target_bytes // (_LANES * itemsize)) // sub * sub)
    if rows <= max_rows:
        return rows                        # single block == full dim (always legal)
    return max_rows


def _unified_2d(x2d, scalars, tile_rows):
    """Run the kernel over a lane-dense (rows, 128) slab; ragged last block is
    masked by Pallas (no wrapper-side padding)."""
    rows, lanes = x2d.shape
    grid = pl.cdiv(rows, tile_rows)
    return pl.pallas_call(
        _unified_kernel,
        out_shape=jax.ShapeDtypeStruct((rows, lanes), x2d.dtype),
        grid_spec=pltpu.PrefetchScalarGridSpec(
            num_scalar_prefetch=1,          # scalars -> SMEM once, pre-grid
            grid=(grid,),
            in_specs=[pl.BlockSpec((tile_rows, lanes), lambda i, s: (i, 0))],
            out_specs=pl.BlockSpec((tile_rows, lanes), lambda i, s: (i, 0)),
        ),
        # TODO(synk): on v7x, pltpu.CORE_PARALLEL on this axis would split the
        # grid across both TensorCores; kept "parallel" for portability.
        compiler_params=pltpu.CompilerParams(
            dimension_semantics=("parallel",)),
    )(scalars, x2d)


def _tail_jnp(x, kap, log_lam, inv_lam):
    """Plain-jnp path for the <128-element lane remainder."""
    xf = x.astype(jnp.float32)
    y = kap * xf - log_lam
    sp = jnp.where(-y > 20.0, y, -jnp.log1p(jnp.exp(jnp.minimum(-y, 20.0))))
    return (jnp.exp(sp * inv_lam) * xf).astype(x.dtype)


def unified_forward(x, lambda_param, kappa_param, *, tile_rows=None):
    """Apply the Unified activation elementwise to x (any shape)."""
    orig_shape = x.shape
    dtype = x.dtype
    total = x.size
    itemsize = jnp.dtype(dtype).itemsize

    # Hoisted scalar preprocessing (done once, not per grid step).
    lam = jnp.maximum(lambda_param.reshape(-1)[0].astype(jnp.float32), 1e-4)
    kap = kappa_param.reshape(-1)[0].astype(jnp.float32)
    log_lam = jnp.log(lam)
    inv_lam = 1.0 / lam
    scalars = jnp.stack([kap, log_lam, inv_lam])   # (3,) f32 -> SMEM prefetch

    x_flat = x.reshape(-1)
    rem = total % _LANES
    aligned = total - rem

    if aligned == 0:
        # Tiny tensor (< 128 elements): not worth a kernel launch.
        return _tail_jnp(x_flat, kap, log_lam, inv_lam).reshape(orig_shape)

    rows = aligned // _LANES
    if tile_rows is None:
        tile_rows = _choose_tile_rows(rows, itemsize)

    if rem == 0:
        out2d = _unified_2d(x_flat.reshape(rows, _LANES), scalars, tile_rows)
        return out2d.reshape(orig_shape)

    # Misaligned total: kernel on the lane-aligned prefix, plain jnp on the
    # (<128-element) remainder.  No full-tensor pad or output slice.
    head = x_flat[:aligned].reshape(rows, _LANES)
    out_head = _unified_2d(head, scalars, tile_rows).reshape(-1)
    out_tail = _tail_jnp(x_flat[aligned:], kap, log_lam, inv_lam)
    return jnp.concatenate([out_head, out_tail]).reshape(orig_shape)


def _reference(x, lambda_param, kappa_param):
    l = jnp.maximum(lambda_param.reshape(-1)[0], 1e-4)
    y = kappa_param.reshape(-1)[0] * x - jnp.log(l)
    sp = jnp.where(-y > 20.0, y, -jnp.log1p(jnp.exp(-y)))
    return jnp.exp(sp / l) * x


if __name__ == "__main__":
    key = jax.random.PRNGKey(0)
    k_x, k_l, k_k, k_x2, k_x3 = jax.random.split(key, 5)

    # Deterministic uniform [0, 1) init (matches torch.nn.init.uniform_ defaults).
    lambda_param = jax.random.uniform(k_l, (1,), dtype=jnp.float32)
    kappa_param = jax.random.uniform(k_k, (1,), dtype=jnp.float32)

    # 1) NCHW input, lane-aligned total (2048 elements) -> single-block path.
    x = jax.random.normal(k_x, (2, 4, 16, 16), dtype=jnp.float32)
    out = jax.block_until_ready(unified_forward(x, lambda_param, kappa_param))
    ref = _reference(x, lambda_param, kappa_param)
    assert out.shape == x.shape and out.dtype == x.dtype
    assert jnp.allclose(out, ref, rtol=1e-5, atol=1e-5), "mismatch (aligned)"

    # 2) Awkward total (1155 = 9*128 + 3) -> aligned-prefix kernel + jnp tail.
    x2 = jax.random.normal(k_x2, (3, 5, 7, 11), dtype=jnp.float32)
    out2 = jax.block_until_ready(unified_forward(x2, lambda_param, kappa_param))
    ref2 = _reference(x2, lambda_param, kappa_param)
    assert out2.shape == x2.shape and out2.dtype == x2.dtype
    assert jnp.allclose(out2, ref2, rtol=1e-5, atol=1e-5), "mismatch (tail)"

    # 3) Ragged grid path: rows=20, forced tile_rows=8 -> masked last block.
    x3 = jax.random.normal(k_x3, (2, 4, 10, 32), dtype=jnp.float32)
    out3 = jax.block_until_ready(
        unified_forward(x3, lambda_param, kappa_param, tile_rows=8))
    ref3 = _reference(x3, lambda_param, kappa_param)
    assert out3.shape == x3.shape and out3.dtype == x3.dtype
    assert jnp.allclose(out3, ref3, rtol=1e-5, atol=1e-5), "mismatch (ragged)"

    print("KERNEL_OK")
</pallas_src>

<mosaic_0001>
module attributes {stable_mosaic.version = 11 : i64} {
  func.func @_unified_kernel(%arg0: i32, %arg1: memref<3xf32, #tpu.memory_space<smem>>, %arg2: memref<16x128xf32, #tpu.memory_space<vmem>>, %arg3: memref<16x128xf32, #tpu.memory_space<vmem>>) attributes {dimension_semantics = [#tpu.dimension_semantics<parallel>], iteration_bounds = array<i64: 1>, scalar_prefetch = 1 : i64, scratch_operands = 0 : i64, tpu.core_type = #tpu.core_type<tc>, window_params = [{transform_indices = @transform_0, window_bounds = array<i64: 16, 128>}, {transform_indices = @transform_1, window_bounds = array<i64: 16, 128>}]} {
    %c0 = arith.constant 0 : index
    %0 = memref.load %arg1[%c0] : memref<3xf32, #tpu.memory_space<smem>>
    %c1 = arith.constant 1 : index
    %1 = memref.load %arg1[%c1] : memref<3xf32, #tpu.memory_space<smem>>
    %c2 = arith.constant 2 : index
    %2 = memref.load %arg1[%c2] : memref<3xf32, #tpu.memory_space<smem>>
    %c0_0 = arith.constant 0 : index
    %c0_1 = arith.constant 0 : index
    %3 = vector.load %arg2[%c0_0, %c0_1] : memref<16x128xf32, #tpu.memory_space<vmem>>, vector<16x128xf32>
    %4 = vector.broadcast %0 : f32 to vector<16x128xf32>
    %5 = arith.mulf %4, %3 : vector<16x128xf32>
    %6 = vector.broadcast %1 : f32 to vector<16x128xf32>
    %7 = arith.subf %5, %6 : vector<16x128xf32>
    %cst = arith.constant 0.000000e+00 : f32
    %8 = vector.broadcast %cst : f32 to vector<16x128xf32>
    %9 = arith.subf %8, %7 : vector<16x128xf32>
    %cst_2 = arith.constant 2.000000e+01 : f32
    %10 = vector.broadcast %cst_2 : f32 to vector<16x128xf32>
    %11 = arith.cmpf ogt, %9, %10 : vector<16x128xf32>
    %cst_3 = arith.constant 2.000000e+01 : f32
    %12 = vector.broadcast %cst_3 : f32 to vector<16x128xf32>
    %13 = arith.minimumf %9, %12 : vector<16x128xf32>
    %14 = math.exp %13 : vector<16x128xf32>
    %15 = math.log1p %14 : vector<16x128xf32>
    %cst_4 = arith.constant 0.000000e+00 : f32
    %16 = vector.broadcast %cst_4 : f32 to vector<16x128xf32>
    %17 = arith.subf %16, %15 : vector<16x128xf32>
    %18 = arith.select %11, %7, %17 : vector<16x128xi1>, vector<16x128xf32>
    %19 = vector.broadcast %2 : f32 to vector<16x128xf32>
    %20 = arith.mulf %18, %19 : vector<16x128xf32>
    %21 = math.exp %20 : vector<16x128xf32>
    %22 = arith.mulf %21, %3 : vector<16x128xf32>
    %c0_5 = arith.constant 0 : index
    %c0_6 = arith.constant 0 : index
    %23 = vector.load %arg3[%c0_5, %c0_6] : memref<16x128xf32, #tpu.memory_space<vmem>>, vector<16x128xf32>
    tpu.vector_store %arg3[%c0_5, %c0_6], %22 {strides = array<i32>} : memref<16x128xf32, #tpu.memory_space<vmem>>, vector<16x128xf32>,
    return
  }
  func.func @transform_0(%arg0: i32, %arg1: memref<3xf32, #tpu.memory_space<smem>>) -> (i32, i32) {
    %c0_i32 = arith.constant 0 : i32
    %c0_i32_0 = arith.constant 0 : i32
    return %arg0, %c0_i32 : i32, i32
  }
  func.func @transform_1(%arg0: i32, %arg1: memref<3xf32, #tpu.memory_space<smem>>) -> (i32, i32) {
    %c0_i32 = arith.constant 0 : i32
    %c0_i32_0 = arith.constant 0 : i32
    return %arg0, %c0_i32 : i32, i32
  }
}

</mosaic_0001>

<bundles_post_ra>
// kernel: tpu_custom_call.1
= control target key start
LH: loop header
LB: loop body
LE: loop exit
PB: predicated region body
PF: predicated region fallthrough
CT: control target
= control target key end

     0   :  { %s240_s0 = inlined_call_operand.hbm [shape: f32[3], index: 0, kind: input, shape index: {}]   ;;  %s241_s1 = inlined_call_operand.hbm [shape: f32[16,128], index: 1, kind: input, shape index: {}]   ;;  %s242_s2 = inlined_call_operand.hbm [shape: f32[16,128], index: 2, kind: output, shape index: {}]  }
   0x1   :  { %s118_s11 = scalar_lea.hbm %s240_s0, 16 }
   0x2   :  { %p119_p0 = scmp.ne.s32.totalorder %s240_s0, %s118_s11  ;;  %p122_p1 = scmp.lt.u32.totalorder %s118_s11, %s240_s0 }
   0x4   :  { %p124_p2 = pnand %p122_p1, %p119_p0 }
   0x6   :  { %127 = shalt.err (!%p124_p2)  }
   0x7   :  { %s178_s16 = smov [#allocation3]  }
   0x8   :  { %8 = dma.hbm_to_smem %s240_s0, 16, %s178_s16, [#allocation2] }
   0x9   :  { %172 = dma.done.wait [#allocation2], 16 }
   0xa   :  { %173 = vsyncadd [#allocation2], 4294967280 }
   0xb   :  { %10 = sfence }
   0xc   :  { %11 = vsyncpa [#allocation5], 0 }
   0xd   :  { %12 = vsyncpa [#allocation6], 0  ;;  %s179_s19 = smov [#allocation4]   ;;  %s128_s23 = scalar_lea.hbm %s241_s1, 256 }
   0xe   :  { %s18_s20 = sshll.u32 %s179_s19, 4  ;;  %p129_p3 = scmp.ne.s32.totalorder %s241_s1, %s128_s23  ;;  %s19_s20 = int_to_ptr.vmem [resolvable:$true] %s18_s20 }
   0xf   :  { %p132_p4 = scmp.lt.u32.totalorder %s128_s23, %s241_s1 }
  0x11   :  { %p134_p5 = pnand %p132_p4, %p129_p3 }
  0x13   :  { %137 = shalt.err (!%p134_p5)
}
  0x14   :  { %s138_s0 = scalar_lea.vmem %s19_s20, 256  ;;  %p143_p7 = scmp.lt.s32.totalorder %s19_s20, %s19_s20 }
  0x15   :  { %p139_p6 = scmp.ne.s32.totalorder %s19_s20, %s138_s0  ;;  %p144_p8 = scmp.lt.s32.totalorder %s138_s0, %s138_s0 }
  0x17   :  { %p145_p9 = por %p144_p8, %p143_p7 }
  0x19   :  { %p146_p10 = pnand %p145_p9, %p139_p6 }
  0x1b   :  { %149 = shalt.err (!%p146_p10)
}
  0x1c   :  { %s180_s28 = smov 128   ;;  %s181_s29 = smov 8  }
  0x1d   :  { %24 = dma.hbm_to_vmem [thread:$0]  %s241_s1, 256, %s19_s20, [#allocation5], %s180_s28, %s180_s28, %s181_s29  }
  0x1e   :  { %174 = dma.done.wait [#allocation5], 256  }
  0x1f   :  { %175 = vsyncadd [#allocation5], 4294967040  ;;  %s28_s4 = sld [smem:[#allocation3]]  ;;  %s99_s5 = sld [smem:[#allocation3 + $0x1]]  ;;  %v31_v0 = vld [vmem:[#allocation4] sm:$0xff]  ;;  %v32_v3 = vld [vmem:[#allocation4 + $0x8] sm:$0xff] }
  0x20   :  { %s100_s1 = sld [smem:[#allocation3 + $0x2]]  ;;  %s182_s6 = smov [#allocation7]  }
  0x21   :  { %s87_s7 = sshll.u32 %s182_s6, 4  ;;  %s88_s7 = int_to_ptr.vmem [resolvable:$true] %s87_s7 }
  0x22   :  { %s150_s8 = scalar_lea.vmem %s88_s7, 256  ;;  %p155_p12 = scmp.lt.s32.totalorder %s88_s7, %s88_s7 }
  0x23   :  { %p151_p11 = scmp.ne.s32.totalorder %s88_s7, %s150_s8  ;;  %p156_p13 = scmp.lt.s32.totalorder %s150_s8, %s150_s8 }
  0x25   :  { %v33_v1 = vstv %s28_s4  ;;  %v36_v2 = vstv %s99_s5  ;;  %p157_p0 = por %p156_p13, %p155_p12 }
  0x26   :  { %v34_v4 = vmul.f32 %v33_v1, %v31_v0  ;;  %v35_v5 = vmul.f32 %v33_v1, %v32_v3  ;;  %v71_v32 = vstv %s100_s1 }
  0x27   :  { %p158_p1 = pnand %p157_p0, %p151_p11 }
  0x28   :  { %v37_v6 = vsub.f32 %v34_v4, %v36_v2  ;;  %v38_v7 = vsub.f32 %v35_v5, %v36_v2 }
  0x2a   :  { %v39_v8 = vsub.f32 0.0, %v37_v6  ;;  %v40_v9 = vsub.f32 0.0, %v38_v7 }
  0x2c   :  { %v43_v10 = vmin.f32 %v39_v8, 20.0  ;;  %v44_v11 = vmin.f32 %v40_v9, 20.0  ;;  %vm41_vm2 = vcmp.gt.f32.partialorder %v39_v8, 20.0  ;;  %vm42_vm3 = vcmp.gt.f32.partialorder %v40_v9, 20.0 }
  0x2e   :  { %v45_v12 = vmul.f32 1.442695, %v43_v10  ;;  %v47_v13 = vmul.f32 1.442695, %v44_v11 }
  0x30   :  { %106 = vpow2.f32 %v45_v12 }
  0x31   :  { %108 = vpow2.f32 %v47_v13 }
  0x3a   :  { %v107_v14 = vpop.eup %106 }
  0x3b   :  { %v109_v15 = vpop.eup %108  ;;  %v49_v16 = vadd.f32 1.0, %v107_v14  ;;  %v52_v18 = vmul.f32 -0.5, %v107_v14  ;;  %v55_v21 = vand.u32 2147483647, %v107_v14 }
  0x3c   :  { %v58_v17 = vadd.f32 1.0, %v109_v15  ;;  %v61_v19 = vmul.f32 -0.5, %v109_v15  ;;  %v64_v23 = vand.u32 2147483647, %v109_v15 }
  0x3d   :  { %110 = vlog2.f32 %v49_v16  ;;  %v53_v20 = vadd.f32 1.0, %v52_v18  ;;  %vm56_vm0 = vcmp.lt.f32.partialorder %v55_v21, 0.0004427343 }
  0x3e   :  { %112 = vlog2.f32 %v58_v17  ;;  %v62_v22 = vadd.f32 1.0, %v61_v19  ;;  %vm65_vm1 = vcmp.lt.f32.partialorder %v64_v23, 0.0004427343 }
  0x3f   :  { %v54_v24 = vmul.f32 %v107_v14, %v53_v20 }
  0x40   :  { %v63_v26 = vmul.f32 %v109_v15, %v62_v22 }
  0x47   :  { %v111_v25 = vpop.eup %110 }
  0x48   :  { %v113_v27 = vpop.eup %112  ;;  %v51_v28 = vmul.f32 0.6931472, %v111_v25 }
  0x49   :  { %v60_v29 = vmul.f32 0.6931472, %v113_v27 }
  0x4a   :  { %v57_v30 = vsel %vm56_vm0, %v54_v24, %v51_v28 }
  0x4b   :  { %v67_v31 = vsub.f32 0.0, %v57_v30  ;;  %v66_v33 = vsel %vm65_vm1, %v63_v26, %v60_v29 }
  0x4c   :  { %v68_v34 = vsub.f32 0.0, %v66_v33 }
  0x4d   :  { %v69_v35 = vsel %vm41_vm2, %v37_v6, %v67_v31 }
  0x4e   :  { %v72_v36 = vmul.f32 %v71_v32, %v69_v35  ;;  %v70_v37 = vsel %vm42_vm3, %v38_v7, %v68_v34 }
  0x4f   :  { %v73_v38 = vmul.f32 %v71_v32, %v70_v37 }
  0x50   :  { %v74_v39 = vmul.f32 1.442695, %v72_v36 }
  0x51   :  { %v76_v40 = vmul.f32 1.442695, %v73_v38 }
  0x52   :  { %114 = vpow2.f32 %v74_v39 }
  0x53   :  { %116 = vpow2.f32 %v76_v40 }
  0x5c   :  { %v115_v41 = vpop.eup %114 }
  0x5d   :  { %v117_v42 = vpop.eup %116  ;;  %v78_v43 = vmul.f32 %v115_v41, %v31_v0 }
  0x5e   :  { %v79_v44 = vmul.f32 %v117_v42, %v32_v3 }
  0x5f   :  { %80 = vst [vmem:[#allocation7] sm:$0xff] %v78_v43 }
  0x60   :  { %81 = vst [vmem:[#allocation7 + $0x8] sm:$0xff] %v79_v44 }
  0x61   :  { %161 = shalt.err (!%p158_p1)
}
  0x62   :  { %s162_s11 = scalar_lea.hbm %s242_s2, 256 }
  0x63   :  { %p163_p2 = scmp.ne.s32.totalorder %s242_s2, %s162_s11  ;;  %p166_p3 = scmp.lt.u32.totalorder %s162_s11, %s242_s2 }
  0x65   :  { %p168_p4 = pnand %p166_p3, %p163_p2 }
  0x67   :  { %171 = shalt.err (!%p168_p4)
}
  0x68   :  { %93 = dma.vmem_to_hbm [thread:$0]  %s88_s7, 256, %s242_s2, [#allocation6], %s180_s28, %s180_s28, %s181_s29  }
  0x69   :  { %176 = dma.done.wait [#allocation6], 256  }
  0x6a   :  { %177 = vsyncadd [#allocation6], 4294967040 }
  0x6b   :  { %97 = vsyncpa [#allocation5], 1 }
  0x6c   :  { %98 = vsyncpa [#allocation6], 1 }

</bundles_post_ra>
